<compile_context>
chip_gen: v6e
topology: v6e:2x2x1
jax: 0.10.0
libtpu: 0.0.40
codegen_flags: <defaults>
</compile_context>

<pallas_src>
import functools

import jax
import jax.numpy as jnp
from jax.experimental import pallas as pl
from jax.experimental.pallas import tpu as pltpu

_LANE = 128
_MAX_UNROLL = 32                      # fully unroll the chunk loop up to this count
_TILE_BYTES = 12 * 1024 * 1024        # per buffered input block (double-buffered)
_VMEM_LIMIT = 48 * 1024 * 1024        # fits v7x's 64 MiB physical VMEM with headroom


def _round_up(x: int, m: int) -> int:
    return ((x + m - 1) // m) * m


def _cdiv(a: int, b: int) -> int:
    return (a + b - 1) // b


def _sum_full_chunks_f32(x_ref, n_full: int):
    """Sum of the first `n_full` 128-lane column chunks of x_ref -> (TR, 128) f32.

    Pure vld + VALU adds (no cross-lane XLU work per element)."""
    def chunk_static(k):
        return x_ref[:, k * _LANE:(k + 1) * _LANE].astype(jnp.float32)

    if n_full <= _MAX_UNROLL:
        acc = chunk_static(0)
        for k in range(1, n_full):
            acc = acc + chunk_static(k)
        return acc

    def body(k, acc):
        off = pl.multiple_of(k * _LANE, _LANE)
        return acc + x_ref[:, pl.ds(off, _LANE)].astype(jnp.float32)

    return jax.lax.fori_loop(1, n_full, body, chunk_static(0), unroll=8)


def _lane_sum_to_row(v):
    """(TR, W) f32 -> (1, TR) f32 row sums (one XLU reduce + relayout per call)."""
    tr, w = v.shape
    return jnp.sum(v.reshape(1, tr, w), axis=-1)


def _mean_onepass_kernel(x_ref, o_ref, *, inv_hw):
    """Whole spatial extent in one block.  x_ref: (TR, HW); o_ref: (1, TR)."""
    tr, hw = x_ref.shape
    n_full, tail = divmod(hw, _LANE)
    row = None
    if n_full:
        row = _lane_sum_to_row(_sum_full_chunks_f32(x_ref, n_full))
    if tail:
        t = _lane_sum_to_row(x_ref[:, n_full * _LANE:hw].astype(jnp.float32))
        row = t if row is None else row + t
    o_ref[...] = (row * inv_hw).astype(o_ref.dtype)


def _mean_multistep_kernel(x_ref, o_ref, acc_ref, *, inv_hw, hw, num_hw_tiles):
    """HW split across grid axis 1.  x_ref: (TR, THW) with THW % 128 == 0;
    acc_ref: (TR, 128) f32 scratch; o_ref: (1, TR)."""
    tr, thw = x_ref.shape
    j = pl.program_id(1)
    n_chunks = thw // _LANE
    last_width = hw - (num_hw_tiles - 1) * thw      # static; 0 < last_width <= thw

    @pl.when(j == 0)
    def _init():
        acc_ref[...] = jnp.zeros_like(acc_ref)

    if last_width == thw:
        acc_ref[...] += _sum_full_chunks_f32(x_ref, n_chunks)
    else:
        @pl.when(j < num_hw_tiles - 1)
        def _full_tiles():
            acc_ref[...] += _sum_full_chunks_f32(x_ref, n_chunks)

        @pl.when(j == num_hw_tiles - 1)
        def _last_tile():
            # Columns >= last_width of this block are out-of-bounds garbage:
            # read only the valid full chunks and statically mask the tail chunk.
            n_last_full, tail = divmod(last_width, _LANE)
            part = None
            if n_last_full:
                part = _sum_full_chunks_f32(x_ref, n_last_full)
            if tail:
                c = x_ref[:, n_last_full * _LANE:(n_last_full + 1) * _LANE]
                c = c.astype(jnp.float32)
                lane_idx = jax.lax.broadcasted_iota(jnp.int32, (tr, _LANE), 1)
                c = jnp.where(lane_idx < tail, c, 0.0)
                part = c if part is None else part + c
            acc_ref[...] += part

    @pl.when(j == num_hw_tiles - 1)
    def _finalize():
        o_ref[...] = (_lane_sum_to_row(acc_ref[...]) * inv_hw).astype(o_ref.dtype)


def flatten_feature_mean(x: jax.Array) -> jax.Array:
    """x: (B, C, *spatial) -> (B, C), mean over all spatial dims (1d/2d/3d)."""
    assert x.ndim >= 3, "expected (B, C, *spatial)"
    B, C = x.shape[0], x.shape[1]
    R = B * C
    HW = 1
    for s in x.shape[2:]:
        HW *= int(s)
    itemsize = jnp.dtype(x.dtype).itemsize
    sublane = max(8, 32 // itemsize)           # dtype-native packed sublane tile

    x2 = x.reshape(R, HW)                      # contiguous reshape, no HBM copy
    inv_hw = float(1.0 / HW)

    # --- reduction (HW) axis: keep the full extent in one block when a
    #     sublane's worth of rows fits the tile budget; otherwise split into
    #     lane-aligned blocks and accumulate across grid steps. ---
    if HW * sublane * itemsize <= _TILE_BYTES:
        THW, num_hw_tiles = HW, 1
    else:
        THW = max(_LANE, (_TILE_BYTES // (sublane * itemsize)) // _LANE * _LANE)
        num_hw_tiles = _cdiv(HW, THW)

    # --- row (B*C) axis: as many rows per block as fit the budget, but at
    #     least two row tiles when possible so v7x's two TensorCores are used. ---
    tr_budget = max(sublane, (_TILE_BYTES // (THW * itemsize)) // sublane * sublane)
    num_r_tiles = _cdiv(R, tr_budget)
    if num_r_tiles == 1 and R > sublane:
        num_r_tiles = 2
    TR = _round_up(_cdiv(R, num_r_tiles), sublane)
    if TR >= R:
        TR, num_r_tiles = R, 1                 # full-dim block (legal for any R)
    else:
        num_r_tiles = _cdiv(R, TR)

    out_shape = jax.ShapeDtypeStruct((num_r_tiles, TR), x.dtype)
    cost = pl.CostEstimate(flops=R * HW, transcendentals=0,
                           bytes_accessed=R * HW * itemsize + R * itemsize)

    if num_hw_tiles == 1:
        out = pl.pallas_call(
            functools.partial(_mean_onepass_kernel, inv_hw=inv_hw),
            out_shape=out_shape,
            grid=(num_r_tiles,),
            in_specs=[pl.BlockSpec((TR, HW), lambda i: (i, 0))],
            out_specs=pl.BlockSpec((1, TR), lambda i: (i, 0)),
            compiler_params=pltpu.CompilerParams(
                dimension_semantics=("parallel",),
                vmem_limit_bytes=_VMEM_LIMIT),
            cost_estimate=cost,
        )(x2)
    else:
        out = pl.pallas_call(
            functools.partial(_mean_multistep_kernel, inv_hw=inv_hw, hw=HW,
                              num_hw_tiles=num_hw_tiles),
            out_shape=out_shape,
            grid=(num_r_tiles, num_hw_tiles),
            in_specs=[pl.BlockSpec((TR, THW), lambda i, j: (i, j))],
            out_specs=pl.BlockSpec((1, TR), lambda i, j: (i, 0)),
            scratch_shapes=[pltpu.VMEM((TR, _LANE), jnp.float32)],
            compiler_params=pltpu.CompilerParams(
                dimension_semantics=("parallel", "arbitrary"),
                vmem_limit_bytes=_VMEM_LIMIT),
            cost_estimate=cost,
        )(x2)

    return out.reshape(num_r_tiles * TR)[:R].reshape(B, C)


# Alias matching the default module configuration ('mean', '2d').
def flatten_feature_mean_2d(x: jax.Array) -> jax.Array:
    assert x.ndim == 4, "expected NCHW"
    return flatten_feature_mean(x)


if __name__ == "__main__":
    key = jax.random.PRNGKey(0)
    B, C, H, W = 2, 4, 16, 16
    x = jax.random.normal(key, (B, C, H, W), dtype=jnp.float32)

    y = flatten_feature_mean_2d(x)
    jax.block_until_ready(y)

    # reference: AdaptiveAvgPool2d((1,1)) + Flatten(start_dim=1)
    y_ref = jnp.mean(x, axis=(2, 3))
    assert y.shape == (B, C), y.shape
    assert jnp.allclose(y, y_ref, atol=1e-5, rtol=1e-5)

    print("KERNEL_OK")
</pallas_src>

<mosaic_0001>
module attributes {stable_mosaic.version = 11 : i64} {
  func.func @_mean_onepass_kernel(%arg0: i32, %arg1: memref<8x256xf32, #tpu.memory_space<vmem>>, %arg2: memref<1x8xf32, #tpu.memory_space<vmem>>) attributes {dimension_semantics = [#tpu.dimension_semantics<parallel>], iteration_bounds = array<i64: 1>, scalar_prefetch = 0 : i64, scratch_operands = 0 : i64, tpu.core_type = #tpu.core_type<tc>, window_params = [{transform_indices = @transform_0, window_bounds = array<i64: 8, 256>}, {transform_indices = @transform_1, window_bounds = array<i64: 1, 8>}]} {
    %c0 = arith.constant 0 : index
    %c0_0 = arith.constant 0 : index
    %0 = vector.load %arg1[%c0, %c0_0] : memref<8x256xf32, #tpu.memory_space<vmem>>, vector<8x128xf32>
    %c0_1 = arith.constant 0 : index
    %c128 = arith.constant 128 : index
    %1 = vector.load %arg1[%c0_1, %c128] : memref<8x256xf32, #tpu.memory_space<vmem>>, vector<8x128xf32>
    %2 = arith.addf %0, %1 : vector<8x128xf32>
    %3 = vector.shape_cast %2 : vector<8x128xf32> to vector<1x8x128xf32>
    %cst = arith.constant dense<0.000000e+00> : vector<1x8xf32>
    %4 = vector.multi_reduction <add>, %3, %cst [2] : vector<1x8x128xf32> to vector<1x8xf32>
    %cst_2 = arith.constant 3.906250e-03 : f32
    %5 = vector.broadcast %cst_2 : f32 to vector<1x8xf32>
    %6 = arith.mulf %4, %5 : vector<1x8xf32>
    %c0_3 = arith.constant 0 : index
    %c0_4 = arith.constant 0 : index
    %7 = vector.load %arg2[%c0_3, %c0_4] : memref<1x8xf32, #tpu.memory_space<vmem>>, vector<1x8xf32>
    tpu.vector_store %arg2[%c0_3, %c0_4], %6 {strides = array<i32>} : memref<1x8xf32, #tpu.memory_space<vmem>>, vector<1x8xf32>,
    return
  }
  func.func @transform_0(%arg0: i32) -> (i32, i32) {
    %c0_i32 = arith.constant 0 : i32
    %c0_i32_0 = arith.constant 0 : i32
    return %arg0, %c0_i32 : i32, i32
  }
  func.func @transform_1(%arg0: i32) -> (i32, i32) {
    %c0_i32 = arith.constant 0 : i32
    %c0_i32_0 = arith.constant 0 : i32
    return %arg0, %c0_i32 : i32, i32
  }
}

</mosaic_0001>

<bundles_post_ra>
// kernel: tpu_custom_call.1
= control target key start
LH: loop header
LB: loop body
LE: loop exit
PB: predicated region body
PF: predicated region fallthrough
CT: control target
= control target key end

     0   :  { %6 = vsyncpa [#allocation3], 0  ;;  %s116_s0 = inlined_call_operand.hbm [shape: f32[8,256], index: 0, kind: input, shape index: {}]   ;;  %s117_s1 = inlined_call_operand.hbm [shape: f32[1,8], index: 1, kind: output, shape index: {}]  }
   0x1   :  { %7 = vsyncpa [#allocation4], 0  ;;  %s98_s6 = smov [#allocation2]  }
   0x2   :  { %s14_s7 = sshll.u32 %s98_s6, 4  ;;  %s15_s7 = int_to_ptr.vmem [resolvable:$true] %s14_s7 }
   0x3   :  { %s62_s8 = scalar_lea.vmem %s15_s7, 256  ;;  %p67_p1 = scmp.lt.s32.totalorder %s15_s7, %s15_s7 }
   0x4   :  { %p63_p0 = scmp.ne.s32.totalorder %s15_s7, %s62_s8  ;;  %p68_p2 = scmp.lt.s32.totalorder %s62_s8, %s62_s8 }
   0x6   :  { %p69_p3 = por %p68_p2, %p67_p1 }
   0x8   :  { %p70_p4 = pnand %p69_p3, %p63_p0 }
   0xa   :  { %73 = shalt.err (!%p70_p4)
}
   0xb   :  { %17 = dma.hbm_to_vmem [thread:$0]  %s116_s0, 256, %s15_s7, [#allocation3]  }
   0xc   :  { %94 = dma.done.wait [#allocation3], 256  }
   0xd   :  { %95 = vsyncadd [#allocation3], 4294967040  ;;  %v21_v0 = vld [vmem:[#allocation2] sm:$0xff]  ;;  %v22_v1 = vld [vmem:[#allocation2 + $0x8] sm:$0xff]  ;;  %v28_v3 = vlaneseq  ;;  %s99_s11 = smov [#allocation5]   ;;  %vm35_vm0 = vcmask 57344  }
   0xe   :  { %v23_v2 = vadd.f32 %v22_v1, %v21_v0  ;;  %s43_s12 = sshll.u32 %s99_s11, 4  ;;  %s44_s12 = int_to_ptr.vmem [resolvable:$true] %s43_s12 }
   0xf   :  { %v29_v4 = vand.u32 127, %v28_v3  ;;  %v31_v5 = vshrl.u32 %v28_v3, 7  ;;  %s74_s13 = scalar_lea.vmem %s44_s12, 16  ;;  %s78_s0 = scalar_lea.vmem %s44_s12, 32 }
  0x10   :  { %24 = vadd.xlane.f32.xlu0 %v23_v2  ;;  %p75_p5 = scmp.ne.s32.totalorder %s44_s12, %s74_s13  ;;  %p79_p6 = scmp.lt.s32.totalorder %s44_s12, %s44_s12 }
  0x11   :  { %v32_v6 = vsub.s32 %v29_v4, %v31_v5  ;;  %p80_p7 = scmp.lt.s32.totalorder %s78_s0, %s74_s13 }
  0x13   :  { %p81_p8 = por %p80_p7, %p79_p6 }
  0x15   :  { %p82_p9 = pnand %p81_p8, %p75_p5 }
  0x99   :  { %v25_v7 = vpop.xlane.xlu0 %24 }
  0x9a   :  { %v26_v8 = vmul.f32 0.00390625, %v25_v7 }
  0x9c   :  { %v33_v9 = vrot.slane %v26_v8, %v32_v6 }
  0x9e   :  { %36 = vst.msk [vmem:[#allocation5] sm:$0x1] %vm35_vm0, %v33_v9 }
  0x9f   :  { %85 = shalt.err (!%p82_p9)
}
  0xa0   :  { %46 = dma.vmem_to_hbm [thread:$0]  %s44_s12, 16, %s117_s1, [#allocation4]  }
  0xa1   :  { %96 = dma.done.wait [#allocation4], 16  }
  0xa2   :  { %97 = vsyncadd [#allocation4], 4294967280 }
  0xa3   :  { %50 = vsyncpa [#allocation3], 1 }
  0xa4   :  { %51 = vsyncpa [#allocation4], 1 }

</bundles_post_ra>
